<compile_context>
chip_gen: v7x
topology: tpu7x:2x2x1
jax: 0.10.0
libtpu: 0.0.40
codegen_flags: <defaults>
</compile_context>

<pallas_src>
import functools
import math

import jax
import jax.numpy as jnp
from jax.experimental import pallas as pl
from jax.experimental.pallas import tpu as pltpu


def _round_up(n, m):
  return ((n + m - 1) // m) * m


def _mlp_kernel(x_ref, head_ref, wb_ref, b_out_ref, o_ref, h_ref, *,
                init_size, hidden, num_hidden_layers):
  """One grid step = one hidden layer of one batch tile.

  x_ref    : [bt, init_size]            f32  (resident across layer axis)
  head_ref : [head_rows, H]             f32  rows: w_in (init_size), b_in, w_out
  wb_ref   : [layer_rows, H]            bf16 current layer: [H,H] weight + bias row
  b_out_ref: [1, 1]                     f32  SMEM scalar
  o_ref    : [bt, 1]                    f32  (written on last layer step only)
  h_ref    : [bt, H]                    f32  VMEM scratch, persists across steps
  """
  H = hidden
  l = pl.program_id(1)

  # --- Input layer (K = init_size is tiny): VPU broadcast-FMAs, not MXU. ---
  @pl.when(l == 0)
  def _():
    x = x_ref[...]                                    # [bt, init_size]
    h = head_ref[init_size:init_size + 1, :]          # b_in  [1, H]
    for i in range(init_size):
      h = h + x[:, i:i + 1] * head_ref[i:i + 1, :]    # [bt,1]*[1,H] -> [bt,H]
    h_ref[...] = jnp.maximum(h, 0.0)

  # --- Current hidden layer: bf16 MXU matmul, f32 accumulation. ---
  w = wb_ref[:H, :]                                   # [H, H] bf16
  b = wb_ref[H:H + 1, :].astype(jnp.float32)          # [1, H]
  z = jnp.dot(h_ref[...].astype(jnp.bfloat16), w,
              preferred_element_type=jnp.float32)
  h_ref[...] = jnp.maximum(z + b, 0.0)

  # --- Output layer (N = 1): VPU multiply + lane reduction, then sigmoid. ---
  @pl.when(l == num_hidden_layers - 1)
  def _():
    w_out = head_ref[init_size + 1:init_size + 2, :]  # [1, H] f32
    zz = jnp.sum(h_ref[...] * w_out, axis=-1, keepdims=True) + b_out_ref[0, 0]
    o_ref[...] = jax.nn.sigmoid(zz)                   # EUP logistic path


def pack_params(params, *, init_size, hidden, num_hidden_layers):
  """Pack parameters once:
       head : [head_rows, H]  f32   (w_in rows, b_in row, w_out row)
       wb   : [L, layer_rows, H] bf16  (per-layer [H,H] weight + bias row)
       b_out: [1, 1] f32 (SMEM scalar)
  """
  w_in, b_in, w_h, b_h, w_out, b_out = params
  H = hidden
  L = num_hidden_layers
  head_rows = _round_up(init_size + 2, 8)    # f32 sublane tile = 8
  layer_rows = _round_up(H + 1, 16)          # bf16 sublane packing = 16

  head = jnp.zeros((head_rows, H), jnp.float32)
  head = head.at[:init_size, :].set(w_in)
  head = head.at[init_size, :].set(b_in.reshape(H))
  head = head.at[init_size + 1, :].set(w_out.reshape(H))

  wb = jnp.zeros((L, layer_rows, H), jnp.bfloat16)
  wb = wb.at[:, :H, :].set(w_h.astype(jnp.bfloat16))
  wb = wb.at[:, H, :].set(b_h.reshape(L, H).astype(jnp.bfloat16))

  b_out_arr = jnp.asarray(b_out, jnp.float32).reshape(1, 1)
  return head, wb, b_out_arr


def _pallas_forward(x, head, wb, b_out, *, init_size, hidden, num_hidden_layers):
  B = x.shape[0]
  H = hidden
  L = num_hidden_layers
  assert L >= 1, "kernel streams one hidden layer per grid step (needs L >= 1)"
  head_rows = head.shape[0]
  layer_rows = wb.shape[1]

  # Batch tiling: shard across TCs on v7x for large B; single tile at small B.
  bt = B if B <= 256 else 256
  assert B % bt == 0
  nbt = B // bt

  kernel = functools.partial(
      _mlp_kernel, init_size=init_size, hidden=H, num_hidden_layers=L)

  return pl.pallas_call(
      kernel,
      out_shape=jax.ShapeDtypeStruct((B, 1), jnp.float32),
      grid=(nbt, L),
      in_specs=[
          # x: resident per batch tile across the layer axis.
          pl.BlockSpec((bt, init_size), lambda b, l: (b, 0)),
          # head (input-layer weights, b_in, w_out): fully resident.
          pl.BlockSpec((head_rows, H), lambda b, l: (0, 0)),
          # per-layer [H,H] weight + bias row, streamed (double-buffered).
          pl.BlockSpec((None, layer_rows, H), lambda b, l: (l, 0, 0)),
          # b_out scalar in SMEM.
          pl.BlockSpec(memory_space=pltpu.MemorySpace.SMEM),
      ],
      out_specs=pl.BlockSpec((bt, 1), lambda b, l: (b, 0)),
      scratch_shapes=[pltpu.VMEM((bt, H), jnp.float32)],
      compiler_params=pltpu.CompilerParams(
          dimension_semantics=("parallel", "arbitrary"),
          vmem_limit_bytes=32 * 1024 * 1024),
  )(x, head, wb, b_out)


def make_simple_mlp(params, *, init_size, hidden, num_hidden_layers):
  """Pack parameters ONCE and return a jitted forward(x) callable."""
  head, wb, b_out = pack_params(
      params, init_size=init_size, hidden=hidden,
      num_hidden_layers=num_hidden_layers)

  @jax.jit
  def forward(x):
    return _pallas_forward(
        x, head, wb, b_out, init_size=init_size, hidden=hidden,
        num_hidden_layers=num_hidden_layers)

  return forward


def init_params(key, init_size, hidden_size, num_hidden_layers):
  """Deterministic init mimicking PyTorch nn.Linear default (uniform +/-1/sqrt(fan_in))."""
  keys = jax.random.split(key, 6)

  def unif(k, shape, fan_in):
    bound = 1.0 / math.sqrt(fan_in)
    return jax.random.uniform(k, shape, jnp.float32, -bound, bound)

  w_in = unif(keys[0], (init_size, hidden_size), init_size)
  b_in = unif(keys[1], (1, hidden_size), init_size)
  w_h = unif(keys[2], (num_hidden_layers, hidden_size, hidden_size), hidden_size)
  b_h = unif(keys[3], (num_hidden_layers, 1, hidden_size), hidden_size)
  w_out = unif(keys[4], (hidden_size, 1), hidden_size)
  b_out = unif(keys[5], (1, 1), hidden_size)
  return (w_in, b_in, w_h, b_h, w_out, b_out)


def reference_forward_f32(x, params):
  """Pure-JAX f32 reference (matches the PyTorch module's math)."""
  w_in, b_in, w_h, b_h, w_out, b_out = params
  h = jnp.maximum(x @ w_in + b_in, 0.0)
  for i in range(w_h.shape[0]):
    h = jnp.maximum(h @ w_h[i] + b_h[i], 0.0)
  return jax.nn.sigmoid(h @ w_out + b_out)


def reference_forward_mixed(x, params):
  """Reference with the same bf16-weight / f32-accumulate scheme as the kernel."""
  w_in, b_in, w_h, b_h, w_out, b_out = params
  h = jnp.maximum(x @ w_in + b_in, 0.0)
  for i in range(w_h.shape[0]):
    z = jnp.dot(h.astype(jnp.bfloat16), w_h[i].astype(jnp.bfloat16),
                preferred_element_type=jnp.float32)
    b = b_h[i].astype(jnp.bfloat16).astype(jnp.float32)
    h = jnp.maximum(z + b, 0.0)
  return jax.nn.sigmoid(h @ w_out + b_out)


if __name__ == "__main__":
  # Small shapes consistent with the module: init_size=2 inputs; hidden width
  # 128 so activation vregs are lane-dense (kernel works for any hidden_size).
  BATCH = 8
  INIT_SIZE = 2
  HIDDEN = 128
  NUM_HIDDEN_LAYERS = 3

  key = jax.random.PRNGKey(0)
  k_x, k_p = jax.random.split(key)
  x = jax.random.normal(k_x, (BATCH, INIT_SIZE), jnp.float32)
  params = init_params(k_p, INIT_SIZE, HIDDEN, NUM_HIDDEN_LAYERS)

  forward = make_simple_mlp(params, init_size=INIT_SIZE, hidden=HIDDEN,
                            num_hidden_layers=NUM_HIDDEN_LAYERS)
  out = jax.block_until_ready(forward(x))

  ref_mixed = reference_forward_mixed(x, params)
  ref_f32 = reference_forward_f32(x, params)

  assert out.shape == (BATCH, 1), out.shape
  assert bool(jnp.all(jnp.isfinite(out)))
  # Tight check against a reference that uses the same bf16-weight scheme.
  assert bool(jnp.allclose(out, ref_mixed, atol=1e-4, rtol=1e-4)), (out, ref_mixed)
  # Loose check against the full-f32 PyTorch-equivalent reference
  # (bf16 weight rounding moves results slightly outside 1e-4).
  assert bool(jnp.allclose(out, ref_f32, atol=3e-2, rtol=3e-2)), (out, ref_f32)

  print("KERNEL_OK")
</pallas_src>

<mosaic_0001>
module attributes {stable_mosaic.version = 11 : i64} {
  func.func @_mlp_kernel(%arg0: i32, %arg1: i32, %arg2: memref<8x2xf32, #tpu.memory_space<vmem>>, %arg3: memref<8x128xf32, #tpu.memory_space<vmem>>, %arg4: memref<1x144x128xbf16, #tpu.memory_space<vmem>>, %arg5: memref<1x1xf32, #tpu.memory_space<smem>>, %arg6: memref<8x1xf32, #tpu.memory_space<vmem>>, %arg7: memref<8x128xf32, #tpu.memory_space<vmem>>) attributes {dimension_semantics = [#tpu.dimension_semantics<parallel>, #tpu.dimension_semantics<arbitrary>], iteration_bounds = array<i64: 1, 3>, scalar_prefetch = 0 : i64, scratch_operands = 1 : i64, tpu.core_type = #tpu.core_type<tc>, window_params = [{transform_indices = @transform_0, window_bounds = array<i64: 8, 2>}, {pipeline_mode = #tpu.pipeline_mode<synchronous>, transform_indices = @transform_1, window_bounds = array<i64: 8, 128>}, {transform_indices = @transform_2, window_bounds = array<i64: 1, 144, 128>}, {transform_indices = @transform_3, window_bounds = array<i64: 1, 1>}, {transform_indices = @transform_4, window_bounds = array<i64: 8, 1>}]} {
    %c0_i32 = arith.constant 0 : i32
    %0 = arith.cmpi eq, %arg1, %c0_i32 : i32
    %1 = arith.extui %0 : i1 to i32
    %c0_i32_0 = arith.constant 0 : i32
    %2 = arith.cmpi ne, %1, %c0_i32_0 : i32
    scf.if %2 {
      %c0_11 = arith.constant 0 : index
      %c0_12 = arith.constant 0 : index
      %19 = vector.load %arg2[%c0_11, %c0_12] : memref<8x2xf32, #tpu.memory_space<vmem>>, vector<8x2xf32>
      %c2 = arith.constant 2 : index
      %c0_13 = arith.constant 0 : index
      %20 = vector.load %arg3[%c2, %c0_13] : memref<8x128xf32, #tpu.memory_space<vmem>>, vector<1x128xf32>
      %21 = vector.extract_strided_slice %19 {offsets = [0, 0], sizes = [8, 1], strides = [1, 1]} : vector<8x2xf32> to vector<8x1xf32>
      %c0_14 = arith.constant 0 : index
      %c0_15 = arith.constant 0 : index
      %22 = vector.load %arg3[%c0_14, %c0_15] : memref<8x128xf32, #tpu.memory_space<vmem>>, vector<1x128xf32>
      %23 = vector.broadcast %21 : vector<8x1xf32> to vector<8x128xf32>
      %24 = vector.broadcast %22 : vector<1x128xf32> to vector<8x128xf32>
      %25 = arith.mulf %23, %24 : vector<8x128xf32>
      %26 = vector.broadcast %20 : vector<1x128xf32> to vector<8x128xf32>
      %27 = arith.addf %26, %25 : vector<8x128xf32>
      %28 = vector.extract_strided_slice %19 {offsets = [0, 1], sizes = [8, 1], strides = [1, 1]} : vector<8x2xf32> to vector<8x1xf32>
      %c1 = arith.constant 1 : index
      %c0_16 = arith.constant 0 : index
      %29 = vector.load %arg3[%c1, %c0_16] : memref<8x128xf32, #tpu.memory_space<vmem>>, vector<1x128xf32>
      %30 = vector.broadcast %28 : vector<8x1xf32> to vector<8x128xf32>
      %31 = vector.broadcast %29 : vector<1x128xf32> to vector<8x128xf32>
      %32 = arith.mulf %30, %31 : vector<8x128xf32>
      %33 = arith.addf %27, %32 : vector<8x128xf32>
      %cst_17 = arith.constant 0.000000e+00 : f32
      %34 = vector.broadcast %cst_17 : f32 to vector<8x128xf32>
      %35 = arith.maximumf %33, %34 : vector<8x128xf32>
      %c0_18 = arith.constant 0 : index
      %c0_19 = arith.constant 0 : index
      %36 = vector.load %arg7[%c0_18, %c0_19] : memref<8x128xf32, #tpu.memory_space<vmem>>, vector<8x128xf32>
      tpu.vector_store %arg7[%c0_18, %c0_19], %35 {strides = array<i32>} : memref<8x128xf32, #tpu.memory_space<vmem>>, vector<8x128xf32>,
    } else {
    }
    %c0 = arith.constant 0 : index
    %c0_1 = arith.constant 0 : index
    %c0_2 = arith.constant 0 : index
    %3 = vector.load %arg4[%c0, %c0_1, %c0_2] : memref<1x144x128xbf16, #tpu.memory_space<vmem>>, vector<1x128x128xbf16>
    %4 = vector.shape_cast %3 : vector<1x128x128xbf16> to vector<128x128xbf16>
    %c0_3 = arith.constant 0 : index
    %c128 = arith.constant 128 : index
    %c0_4 = arith.constant 0 : index
    %5 = vector.load %arg4[%c0_3, %c128, %c0_4] : memref<1x144x128xbf16, #tpu.memory_space<vmem>>, vector<1x1x128xbf16>
    %6 = vector.shape_cast %5 : vector<1x1x128xbf16> to vector<1x128xbf16>
    %7 = arith.extf %6 : vector<1x128xbf16> to vector<1x128xf32>
    %c0_5 = arith.constant 0 : index
    %c0_6 = arith.constant 0 : index
    %8 = vector.load %arg7[%c0_5, %c0_6] : memref<8x128xf32, #tpu.memory_space<vmem>>, vector<8x128xf32>
    %9 = arith.truncf %8 : vector<8x128xf32> to vector<8x128xbf16>
    %cst = arith.constant dense<0.000000e+00> : vector<8x128xf32>
    %10 = tpu.matmul %9, %4, %cst {dimension_numbers = #tpu.dot_dimension_numbers<[1], [0], [0], [1], [0, 0, 1, 1], [], []>} : vector<8x128xbf16>, vector<128x128xbf16>, vector<8x128xf32> -> vector<8x128xf32>
    %11 = vector.broadcast %7 : vector<1x128xf32> to vector<8x128xf32>
    %12 = arith.addf %10, %11 : vector<8x128xf32>
    %cst_7 = arith.constant 0.000000e+00 : f32
    %13 = vector.broadcast %cst_7 : f32 to vector<8x128xf32>
    %14 = arith.maximumf %12, %13 : vector<8x128xf32>
    %c0_8 = arith.constant 0 : index
    %c0_9 = arith.constant 0 : index
    %15 = vector.load %arg7[%c0_8, %c0_9] : memref<8x128xf32, #tpu.memory_space<vmem>>, vector<8x128xf32>
    tpu.vector_store %arg7[%c0_8, %c0_9], %14 {strides = array<i32>} : memref<8x128xf32, #tpu.memory_space<vmem>>, vector<8x128xf32>,
    %c2_i32 = arith.constant 2 : i32
    %16 = arith.cmpi eq, %arg1, %c2_i32 : i32
    %17 = arith.extui %16 : i1 to i32
    %c0_i32_10 = arith.constant 0 : i32
    %18 = arith.cmpi ne, %17, %c0_i32_10 : i32
    scf.if %18 {
      %c3 = arith.constant 3 : index
      %c0_11 = arith.constant 0 : index
      %19 = vector.load %arg3[%c3, %c0_11] : memref<8x128xf32, #tpu.memory_space<vmem>>, vector<1x128xf32>
      %c0_12 = arith.constant 0 : index
      %c0_13 = arith.constant 0 : index
      %20 = vector.load %arg7[%c0_12, %c0_13] : memref<8x128xf32, #tpu.memory_space<vmem>>, vector<8x128xf32>
      %21 = vector.broadcast %19 : vector<1x128xf32> to vector<8x128xf32>
      %22 = arith.mulf %20, %21 : vector<8x128xf32>
      %cst_14 = arith.constant dense<0.000000e+00> : vector<8xf32>
      %23 = vector.multi_reduction <add>, %22, %cst_14 [1] : vector<8x128xf32> to vector<8xf32>
      %24 = vector.shape_cast %23 : vector<8xf32> to vector<8x1xf32>
      %c0_15 = arith.constant 0 : index
      %c0_16 = arith.constant 0 : index
      %25 = memref.load %arg5[%c0_15, %c0_16] : memref<1x1xf32, #tpu.memory_space<smem>>
      %26 = vector.broadcast %25 : f32 to vector<8x1xf32>
      %27 = arith.addf %24, %26 : vector<8x1xf32>
      %28 = arith.negf %27 : vector<8x1xf32>
      %29 = math.exp %28 : vector<8x1xf32>
      %cst_17 = arith.constant 1.000000e+00 : f32
      %30 = vector.broadcast %cst_17 : f32 to vector<8x1xf32>
      %31 = arith.addf %30, %29 : vector<8x1xf32>
      %32 = arith.divf %30, %31 : vector<8x1xf32>
      %c0_18 = arith.constant 0 : index
      %c0_19 = arith.constant 0 : index
      %33 = vector.load %arg6[%c0_18, %c0_19] : memref<8x1xf32, #tpu.memory_space<vmem>>, vector<8x1xf32>
      tpu.vector_store %arg6[%c0_18, %c0_19], %32 {strides = array<i32>} : memref<8x1xf32, #tpu.memory_space<vmem>>, vector<8x1xf32>,
    } else {
    }
    return
  }
  func.func @transform_0(%arg0: i32, %arg1: i32) -> (i32, i32) {
    %c0_i32 = arith.constant 0 : i32
    %c0_i32_0 = arith.constant 0 : i32
    return %arg0, %c0_i32 : i32, i32
  }
  func.func @transform_1(%arg0: i32, %arg1: i32) -> (i32, i32) {
    %c0_i32 = arith.constant 0 : i32
    %c0_i32_0 = arith.constant 0 : i32
    %c0_i32_1 = arith.constant 0 : i32
    return %c0_i32, %c0_i32_0 : i32, i32
  }
  func.func @transform_2(%arg0: i32, %arg1: i32) -> (i32, i32, i32) {
    %c0_i32 = arith.constant 0 : i32
    %c0_i32_0 = arith.constant 0 : i32
    %c0_i32_1 = arith.constant 0 : i32
    return %arg1, %c0_i32, %c0_i32_0 : i32, i32, i32
  }
  func.func @transform_3(%arg0: i32, %arg1: i32) -> (i32, i32) {
    %c0_i32 = arith.constant 0 : i32
    %c0_i32_0 = arith.constant 0 : i32
    %c0_i32_1 = arith.constant 0 : i32
    return %c0_i32, %c0_i32_0 : i32, i32
  }
  func.func @transform_4(%arg0: i32, %arg1: i32) -> (i32, i32) {
    %c0_i32 = arith.constant 0 : i32
    %c0_i32_0 = arith.constant 0 : i32
    return %arg0, %c0_i32 : i32, i32
  }
}

</mosaic_0001>

<bundles_post_ra>
// kernel: forward.1
= control target key start
LH: loop header
LB: loop body
LE: loop exit
PB: predicated region body
PF: predicated region fallthrough
CT: control target
= control target key end

     0   :  { %s897_s0 = inlined_call_operand.vmem [shape: f32[8,2], index: 0, kind: input, shape index: {}]   ;;  %s898_s1 = inlined_call_operand.vmem [shape: f32[8,128], index: 1, kind: input, shape index: {}]   ;;  %s899_s2 = inlined_call_operand.hbm [shape: bf16[3,144,128], index: 2, kind: input, shape index: {}]   ;;  %s900_s3 = inlined_call_operand.<no memory space> [shape: f32[1,1], index: 3, kind: input, shape index: {}]   ;;  %s901_s4 = inlined_call_operand.vmem [shape: f32[8,1], index: 4, kind: output, shape index: {}]  }
   0x1   :  { %9 = sst [smem:[#allocation3]] %s900_s3 }
   0x2   :  { %10 = vsyncpa [#allocation5], 0 }
   0x3   :  { %12 = vsyncpa [#allocation5 + $0x1], 0  ;;  %s753_s17 = smov 0   ;;  %s755_s18 = smov 0  }
   0x4   :  { %s757_s19 = smov 0   ;;  %s759_s20 = smov 0  }
   0x5   :  { %s761_s21 = smov 0   ;;  %s763_s22 = smov 0  }
   0x6 LB: > { %s505_s3 = sadd.s32 4294967295, %s716_s22   ;;  %s27_s23 = sadd.s32 1, %s712_s21  ;;  %s716_s22 = sphi %s763_s22, %s18_s22   ;;  %s712_s21 = sphi %s761_s21, %s908_s21   ;;  %s708_s20 = sphi %s759_s20, %s907_s20   ;;  %s704_s19 = sphi %s757_s19, %s906_s19   ;;  %s700_s18 = sphi %s755_s18, %s905_s18   ;;  %s696_s17 = sphi %s753_s17, %s904_s17  }
   0x7   : > { %p28_p0 = scmp.ge.s32.totalorder %s27_s23, 3  ;;  %s84_s24 = sadd.s32 1, %s704_s19 }
   0x8   : > { %p91_p1 = scmp.ne.s32.totalorder %s704_s19, %s700_s18  ;;  %p92_p2 = scmp.eq.s32.totalorder %s716_s22, 0 }
   0x9   : > { %s910_s23 = smov (%p28_p0, %s27_s23), 0  ;;  %p97_p4 = scmp.ne.s32.totalorder %s700_s18, %s696_s17 }
   0xa   : > { %p93_p3 = por %p92_p2, %p91_p1  ;;  %s81_s25 = ssub.s32 %s712_s21, %s910_s23 }
   0xb   : > { %p98_p5 = scmp.eq.s32.totalorder %s505_s3, 0  ;;  %p82_p6 = scmp.eq.s32.totalorder %s81_s25, 0 }
   0xc   : > { %p567_p8 = scmp.lt.s32.totalorder %s716_s22, 3  ;;  %s181_s28 = sand.u32 1, %s704_s19  }
   0xd   : > { %p792_p7 = por %p98_p5, %p97_p4  ;;  %s559_s29 = smul.u32 1152, %s712_s21 }
   0xe   : > { %s798_s27 = scalar_select %p82_p6, %s704_s19, %s84_s24  }
   0xf   : > { %s558_s30 = smul.u32 72, %s181_s28  ;;  %s805_s7 = scalar_lea.hbm %s899_s2, %s559_s29 }
  0x10   : > { %p807_p9 = pnand %p567_p8, %p93_p3  ;;  %s813_s11 = scalar_lea.sflag [#allocation5], %s181_s28 }
  0x11   : > { %s185_s9 = scalar_lea.vmem [#allocation4], %s558_s30  ;;  %s636_s12 = scalar_lea.hbm %s805_s7, 1152 }
  0x12   : > { %s192_s10 = sshll.u32 %s185_s9, 4  ;;  %p637_p10 = scmp.ne.s32.totalorder %s805_s7, %s636_s12  ;;  %s811_s10 = int_to_ptr.vmem [resolvable:$true] %s192_s10 }
  0x13   : > { %p638_p11 = pneg %p807_p9  ;;  %s641_s15 = scalar_lea.hbm %s899_s2, 3456 }
  0x14   : > { %p642_p0 = scmp.lt.u32.totalorder %s805_s7, %s899_s2  ;;  %p643_p1 = scmp.lt.u32.totalorder %s641_s15, %s636_s12 }
  0x15   : > { %p639_p12 = pnand %p638_p11, %p637_p10  ;;  %p645_p3 = scmp.lt.u32.totalorder %s636_s12, %s805_s7 }
  0x16   : > { %p644_p2 = por %p643_p1, %p642_p0 }
  0x17   : > { %p640_p13 = pneg %p639_p12 }
  0x18   : > { %p646_p4 = por %p645_p3, %p644_p2 }
  0x1a   : > { %p647_p5 = pnand %p646_p4, %p640_p13 }
  0x1c   : > { %650 = shalt.err (!%p647_p5)
}
  0x1d   : > { %s651_s3 = scalar_lea.vmem %s811_s10, 1152  ;;  %s718_s24 = smov [#allocation4]  }
  0x1e   : > { %p652_p6 = scmp.ne.s32.totalorder %s811_s10, %s651_s3  ;;  %s656_s25 = sshll.u32 %s718_s24, 4  ;;  %s657_s25 = int_to_ptr.vmem [resolvable:$false] %s656_s25 }
  0x1f   : > { %s658_s28 = scalar_lea.vmem %s657_s25, 2304  ;;  %p659_p12 = scmp.lt.s32.totalorder %s811_s10, %s657_s25 }
  0x20   : > { %p654_p8 = pnand %p652_p6, %p638_p11  ;;  %p660_p0 = scmp.lt.s32.totalorder %s658_s28, %s651_s3 }
  0x22   : > { %p655_p10 = pneg %p654_p8  ;;  %p661_p1 = por %p660_p0, %p659_p12 }
  0x24   : > { %p662_p2 = pnand %p661_p1, %p655_p10 }
  0x26   : > { %665 = shalt.err (!%p662_p2)
}
  0x27   : > { %s719_s29 = smov 64   ;;  %s720_s30 = smov 4  }
  0x28   : > { %566 = dma.hbm_to_vmem [thread:$0]  (!%p807_p9), %s805_s7, 1152, %s811_s10, %s813_s11, %s719_s29, %s719_s29, %s720_s30  }
  0x29   : > { %p510_p11 = scmp.ge.s32.totalorder %s716_s22, 1  ;;  %p200_p13 = scmp.lt.s32.totalorder %s716_s22, 4 }
  0x2b   : > { %p201_p3 = pnand %p510_p11, %p200_p13 }
  0x2c   : > { %s206_s5 = sand.u32 (!%p201_p3), 1, %s700_s18  }
  0x2d   : > { %204 = sbr.rel (%p201_p3) target bundleno = 626 (0x272), region = 36  ;;  %s207_s9 = scalar_lea.sflag (!%p201_p3), [#allocation5], %s206_s5 }
  0x2e   : > { %s560_s6 = smul.u32 (!%p201_p3), 72, %s206_s5 }
  0x30   : > { %s844_s12 = scalar_lea.vmem (!%p201_p3), [#allocation4], %s560_s6 }
  0x34   : > { %691 = dma.done.wait (%p792_p7), %s207_s9, 1152  }
  0x35   : > { %693 = vsyncadd (%p792_p7), %s207_s9, 4294966144  ;;  %p511_p4 = scmp.ne.s32.totalorder %s708_s20, 0 }
  0x36   : > { %v251_v0 = vld [vmem:[%s897_s0] sm:$0xff] (!%p511_p4)  ;;  %v721_v1 = vmov (!%p511_p4), 0   ;;  %v722_v2 = vmov (!%p511_p4), 1  }
  0x37   : > { %250 = sbr.rel (%p511_p4) target bundleno = 196 (0xc4), region = 44  ;;  %622 = vset.pattern.permute.xlu0 (!%p511_p4), %v721_v1  ;;  %v512_v3 = vld [vmem:[%s898_s1] ss:$0 sm:$0xff] (!%p511_p4)  ;;  %v513_v6 = vld [vmem:[%s898_s1 + $0x2] ss:$0 sm:$0xff] (!%p511_p4) }
  0x38   : > { %256 = vperm.xlu0 (!%p511_p4), %622, %v251_v0   ;;  %v514_v7 = vld [vmem:[%s898_s1 + $0x1] ss:$0 sm:$0xff] (!%p511_p4) }
  0x3c   : > { %623 = vset.pattern.permute.xlu0 (!%p511_p4), %v722_v2 }
  0x3d   : > { %271 = vperm.xlu0 (!%p511_p4), %623, %v251_v0  }
  0xb7   : > { %v257_v4 = vpop.permute.xlu0 %256 }
  0xb8   : > { %v263_v5 = vmul.f32 %v512_v3, %v257_v4 }
  0xba   : > { %v268_v9 = vadd.f32 %v513_v6, %v263_v5 }
  0xbc   : > { %v272_v8 = vpop.permute.xlu0 %271 }
  0xbd   : > { %v278_v10 = vmul.f32 %v514_v7, %v272_v8 }
  0xbf   : > { %v279_v11 = vadd.f32 %v278_v10, %v268_v9 }
  0xc1   : > { %v280_v12 = vmax.f32 %v279_v11, 0.0 }
  0xc3   : > { %281 = vst [vmem:[#allocation2] sm:$0xff] %v280_v12 }
  0xc4 PF: > { %v624_v13 = vld [vmem:[%s844_s12] sm:$0xff]   ;;  %v723_v14 = vmov 0.0   ;;  %v625_v15 = vld [vmem:[%s844_s12 + $0x8] sm:$0xff]   ;;  %vm724_vm0 = vmmov 0   ;;  %v626_v16 = vld [vmem:[%s844_s12 + $0x10] sm:$0xff]   ;;  %v302_v24 = vlaneseq  ;;  %p523_p7 = scmp.ne.s32.totalorder %s708_s20, 2 }
  0xc5   : > { %538 = vmatprep.subr.bf16.mxu0 %v723_v14  ;;  %554 = vmatprep.mubr.msk.bf16.mxu0 %vm724_vm0, %v723_v14  ;;  %v627_v17 = vld [vmem:[%s844_s12 + $0x18] sm:$0xff]   ;;  %v628_v18 = vld [vmem:[%s844_s12 + $0x20] sm:$0xff]   ;;  %v629_v19 = vld [vmem:[%s844_s12 + $0x28] sm:$0xff]   ;;  %s409_s3 = sld [smem:[#allocation3]] (!%p523_p7)  ;;  %vm418_vm1 = vcmask (!%p523_p7), 7168  }
  0xc6   : > { %539 = vmatpush3.bf16.msra.mxu0 %v624_v13  ;;  %v630_v20 = vld [vmem:[%s844_s12 + $0x30] sm:$0xff]   ;;  %v631_v21 = vld [vmem:[%s844_s12 + $0x38] sm:$0xff]   ;;  %v303_v25 = vshrl.u32 %v302_v24, 7  ;;  %v298_v26 = vld [vmem:[%s844_s12 + $0x40] sm:$0x1] }
  0xc7   : > { %540 = vmatprep.subr.bf16.mxu0 %v723_v14  ;;  %v299_v27 = vunpack.c.l.bf16 %v298_v26  ;;  %v524_v36 = vld [vmem:[%s898_s1 + $0x3] ss:$0 sm:$0xff] (!%p523_p7) }
  0xc8   : > { %v304_v28 = vsub.s32 0, %v303_v25 }
  0xca   : > { %541 = vmatpush3.bf16.msra.mxu0 %v625_v15  ;;  %v300_v22 = vld [vmem:[#allocation2] sm:$0xff]  ;;  %v305_v29 = vrot.slane %v299_v27, %v304_v28 }
  0xcb   : > { %542 = vmatprep.subr.bf16.mxu0 %v723_v14  ;;  %v301_v23 = vpack.c.bf16 %v300_v22, %v300_v22  ;;  %v410_v39 = vstv (!%p523_p7), %s409_s3 }
  0xce   : > { %543 = vmatpush3.bf16.msra.mxu0 %v626_v16 }
  0xcf   : > { %544 = vmatprep.subr.bf16.mxu0 %v723_v14 }
  0xd2   : > { %545 = vmatpush3.bf16.msra.mxu0 %v627_v17 }
  0xd3   : > { %546 = vmatprep.subr.bf16.mxu0 %v723_v14 }
  0xd6   : > { %547 = vmatpush3.bf16.msra.mxu0 %v628_v18 }
  0xd7   : > { %548 = vmatprep.subr.bf16.mxu0 %v723_v14 }
  0xda   : > { %549 = vmatpush3.bf16.msra.mxu0 %v629_v19 }
  0xdb   : > { %550 = vmatprep.subr.bf16.mxu0 %v723_v14 }
  0xde   : > { %551 = vmatpush3.bf16.msra.mxu0 %v630_v20 }
  0xdf   : > { %552 = vmatprep.subr.bf16.mxu0 %v723_v14 }
  0xe2   : > { %553 = vmatpush3.bf16.msra.mxu0 %v631_v21 }
  0xe5   : > { %555 = vmatmul.mubr.bf16.vlgmr.msra.gmra.mrb[0].mxu0 %v301_v23 }
 0x1b7   : > { %399 = sbr.rel (%p523_p7) target bundleno = 626 (0x272), region = 48 }
 0x1b8   : > { %v388_v30 = vpop.f32.mrb[0].mxu0 }
 0x1b9   : > { %v389_v31 = vadd.f32 %v388_v30, %v305_v29  ;;  %v556_v32 = vpop.f32.mrb[1].mxu0 }
 0x1ba   : > { %v391_v33 = vpop.f32.mrb[2].mxu0 }
 0x1bb   : > { %v394_v34 = vmax.f32 %v389_v31, 0.0  ;;  %v557_v35 = vpop.f32.mrb[3].mxu0 }
 0x1bd   : > { %395 = vst [vmem:[#allocation2] sm:$0xff] %v394_v34 }
 0x1c4   : > { %v401_v37 = vld [vmem:[#allocation2] sm:$0xff] }
 0x1c5   : > { %v406_v38 = vmul.f32 %v524_v36, %v401_v37 }
 0x1c7   : > { %407 = vadd.xlane.f32.xlu0 %v406_v38 }
 0x254   : > { %v408_v40 = vpop.xlane.xlu0 %407 }
 0x255   : > { %v411_v41 = vadd.f32 %v410_v39, %v408_v40 }
 0x257   : > { %v525_v42 = vmul.f32 -1.442695, %v411_v41 }
 0x259   : > { %632 = vpow2.f32 %v525_v42 }
 0x263   : > { %v633_v43 = vpop.eup %632 }
 0x264   : > { %v415_v44 = vadd.f32 1.0, %v633_v43 }
 0x266   : > { %634 = vrcp.f32 %v415_v44 }
 0x270   : > { %v635_v45 = vpop.eup %634 }
 0x271   : > { %419 = vst.msk [vmem:[%s901_s4] sm:$0xff] %vm418_vm1, %v635_v45 }
 0x272 PF: > { %s18_s22 = sadd.s32 1, %s716_s22   ;;  %s904_s17 = smov %s700_s18 }
 0x273   : > { %p15_p9 = scmp.ge.s32.totalorder %s18_s22, 5   ;;  %s905_s18 = smov %s704_s19 }
 0x274   : > { %s906_s19 = smov %s798_s27  ;;  %s907_s20 = smov %s712_s21 }
 0x275   : > { %s908_s21 = smov %s910_s23  ;;  %17 = sbr.rel (!%p15_p9) target bundleno = 6 (0x6), region = 87 }
 0x27c   :  { %439 = vsyncpa [#allocation5], 1 }
 0x27d   :  { %441 = vsyncpa [#allocation5 + $0x1], 1 }

</bundles_post_ra>
